<compile_context>
chip_gen: v7x
topology: tpu7x:2x2x1
jax: 0.10.0
libtpu: 0.0.40
codegen_flags: <defaults>
</compile_context>

<pallas_src>
import functools

import jax
import jax.numpy as jnp
from jax.experimental import pallas as pl
from jax.experimental.pallas import tpu as pltpu


_LANE = 128
_DEF_COMPUTE_DTYPE = jnp.bfloat16
_VMEM_BUDGET = 40 * 1024 * 1024      # conservative working-set cap (fits v7x 64 MiB)


def _round_up(a: int, b: int) -> int:
    return ((a + b - 1) // b) * b


def _row_align(dtype) -> int:
    # bf16 packs 2 rows per sublane -> pad batch rows to 16; f32 -> 8.
    return 16 if jnp.dtype(dtype).itemsize < 4 else 8


def _vmem_limit(working_set_bytes: int) -> int:
    return int(min(max(working_set_bytes + (4 << 20), 32 << 20), 64 << 20))


def _pad2(a, rows, cols):
    if a.shape[0] == rows and a.shape[1] == cols:
        return a
    return jnp.pad(a, ((0, rows - a.shape[0]), (0, cols - a.shape[1])))


def _pad_row(v, n_pad):
    v = v.astype(jnp.float32).reshape(1, -1)
    if v.shape[1] != n_pad:
        v = jnp.pad(v, ((0, 0), (0, n_pad - v.shape[1])))
    return v


# ----------------------------------------------------------------------------
# Kernels
# ----------------------------------------------------------------------------
def _linear_resident_bias_kernel(x_ref, w_ref, b_ref, o_ref):
    """Whole-K in one block; weight stays resident across the M grid."""
    o_ref[...] = (jnp.dot(x_ref[...], w_ref[...],
                          preferred_element_type=jnp.float32)
                  + b_ref[...]).astype(o_ref.dtype)


def _linear_resident_kernel(x_ref, w_ref, o_ref):
    o_ref[...] = jnp.dot(x_ref[...], w_ref[...],
                         preferred_element_type=jnp.float32).astype(o_ref.dtype)


def _linear_tiled_bias_kernel(x_ref, w_ref, b_ref, o_ref, acc_ref):
    """One (tm, tn) output tile reduced over the K grid axis (axis 2)."""
    k = pl.program_id(2)

    @pl.when(k == 0)
    def _():
        acc_ref[...] = jnp.zeros_like(acc_ref)

    acc_ref[...] += jnp.dot(x_ref[...], w_ref[...],
                            preferred_element_type=jnp.float32)

    @pl.when(k == pl.num_programs(2) - 1)
    def _():
        o_ref[...] = (acc_ref[...] + b_ref[...]).astype(o_ref.dtype)


def _linear_tiled_nobias_kernel(x_ref, w_ref, o_ref, acc_ref):
    k = pl.program_id(2)

    @pl.when(k == 0)
    def _():
        acc_ref[...] = jnp.zeros_like(acc_ref)

    acc_ref[...] += jnp.dot(x_ref[...], w_ref[...],
                            preferred_element_type=jnp.float32)

    @pl.when(k == pl.num_programs(2) - 1)
    def _():
        o_ref[...] = acc_ref[...].astype(o_ref.dtype)


def _linear_bn_kernel(x_ref, w_ref, g_ref, b_ref, o_ref, acc_ref,
                      *, m_valid: int, eps: float):
    """Fused linear + training-mode BatchNorm1d.

    Grid is (N tiles, K tiles); the whole (padded) batch lives in one block.
    Batch-axis (sublane) mean/var are computed with a masked ones-row MXU
    matmul instead of XLU cross-sublane reductions; padded batch rows are
    masked out of the statistics.
    """
    k = pl.program_id(1)

    @pl.when(k == 0)
    def _():
        acc_ref[...] = jnp.zeros_like(acc_ref)

    acc_ref[...] += jnp.dot(x_ref[...], w_ref[...],
                            preferred_element_type=jnp.float32)

    @pl.when(k == pl.num_programs(1) - 1)
    def _():
        z = acc_ref[...]                                    # (m_pad, tn) f32
        m_pad = z.shape[0]
        inv_m = jnp.float32(1.0 / m_valid)
        if m_pad == m_valid:
            ones_row = jnp.ones((1, m_pad), jnp.float32)
        else:
            col = jax.lax.broadcasted_iota(jnp.int32, (1, m_pad), 1)
            ones_row = (col < m_valid).astype(jnp.float32)
        mean = jnp.dot(ones_row, z,
                       preferred_element_type=jnp.float32) * inv_m      # (1, tn)
        centered = z - mean
        var = jnp.dot(ones_row, centered * centered,
                      preferred_element_type=jnp.float32) * inv_m       # (1, tn)
        inv_std = jax.lax.rsqrt(var + jnp.float32(eps))
        o_ref[...] = (centered * (inv_std * g_ref[...])
                      + b_ref[...]).astype(o_ref.dtype)


# ----------------------------------------------------------------------------
# Wrappers
# ----------------------------------------------------------------------------
def pallas_linear(x, w_t, bias=None, *, compute_dtype=_DEF_COMPUTE_DTYPE,
                  out_dtype=None, force_tiled=False, tile_caps=None):
    """y = x @ w_t (+ bias).  x: (M, K); w_t: (K, N); bias: (N,) or None."""
    M, K = x.shape
    Kw, N = w_t.shape
    assert K == Kw
    out_dtype = out_dtype or x.dtype
    cdt = compute_dtype or x.dtype
    itemsize = jnp.dtype(cdt).itemsize
    out_itemsize = jnp.dtype(out_dtype).itemsize

    if x.dtype != cdt:
        x = x.astype(cdt)
    if w_t.dtype != cdt:
        w_t = w_t.astype(cdt)     # pre-cast in init_params -> usually a no-op

    ra = _row_align(cdt)
    m0 = _round_up(M, ra)
    n0 = _round_up(N, _LANE)
    k0 = _round_up(K, _LANE)

    # ---------------- weight-resident single-pass fast path ----------------
    if not force_tiled:
        tm = min(m0, 512)
        working = (2 * (k0 * n0 + tm * k0) * itemsize
                   + 2 * tm * n0 * out_itemsize)
        if working <= _VMEM_BUDGET:
            m_pad = _round_up(m0, tm)
            m_tiles = m_pad // tm
            # Keep both v7x TensorCores busy when M collapses to one tile.
            tn = n0 // 2 if (m_tiles == 1 and n0 % 256 == 0) else n0
            n_pad = n0
            grid = (m_tiles, n_pad // tn)

            xp = _pad2(x, m_pad, k0)
            wp = _pad2(w_t, k0, n_pad)

            cost = pl.CostEstimate(
                flops=2 * m_pad * n_pad * k0,
                transcendentals=0,
                bytes_accessed=int(xp.size * itemsize + wp.size * itemsize
                                   + m_pad * n_pad * out_itemsize))
            cparams = pltpu.CompilerParams(
                dimension_semantics=("parallel", "parallel"),
                vmem_limit_bytes=_vmem_limit(
                    2 * (tm * k0 + k0 * tn) * itemsize
                    + 2 * tm * tn * out_itemsize))

            x_spec = pl.BlockSpec((tm, k0), lambda i, j: (i, 0))
            w_spec = pl.BlockSpec((k0, tn), lambda i, j: (0, j))
            o_spec = pl.BlockSpec((tm, tn), lambda i, j: (i, j))

            if bias is not None:
                out = pl.pallas_call(
                    _linear_resident_bias_kernel,
                    out_shape=jax.ShapeDtypeStruct((m_pad, n_pad), out_dtype),
                    grid_spec=pltpu.PrefetchScalarGridSpec(
                        num_scalar_prefetch=0, grid=grid,
                        in_specs=[x_spec, w_spec,
                                  pl.BlockSpec((1, tn), lambda i, j: (0, j))],
                        out_specs=o_spec),
                    compiler_params=cparams, cost_estimate=cost,
                )(xp, wp, _pad_row(bias, n_pad))
            else:
                out = pl.pallas_call(
                    _linear_resident_kernel,
                    out_shape=jax.ShapeDtypeStruct((m_pad, n_pad), out_dtype),
                    grid_spec=pltpu.PrefetchScalarGridSpec(
                        num_scalar_prefetch=0, grid=grid,
                        in_specs=[x_spec, w_spec], out_specs=o_spec),
                    compiler_params=cparams, cost_estimate=cost,
                )(xp, wp)
            return out[:M, :N]

    # ---------------------------- tiled path -------------------------------
    cap_m, cap_n, cap_k = tile_caps if tile_caps is not None else (512, 512, 1024)
    tm, tn, tk = min(m0, cap_m), min(n0, cap_n), min(k0, cap_k)
    m_pad, n_pad, k_pad = _round_up(m0, tm), _round_up(n0, tn), _round_up(k0, tk)
    grid = (m_pad // tm, n_pad // tn, k_pad // tk)

    xp = _pad2(x, m_pad, k_pad)
    wp = _pad2(w_t, k_pad, n_pad)

    cost = pl.CostEstimate(
        flops=2 * m_pad * n_pad * k_pad,
        transcendentals=0,
        # x is re-read once per N tile, w once per M tile.
        bytes_accessed=int(xp.size * itemsize * grid[1]
                           + wp.size * itemsize * grid[0]
                           + m_pad * n_pad * out_itemsize))
    cparams = pltpu.CompilerParams(
        dimension_semantics=("parallel", "parallel", "arbitrary"),
        vmem_limit_bytes=_vmem_limit(2 * (tm * tk + tk * tn) * itemsize
                                     + 2 * tm * tn * out_itemsize
                                     + tm * tn * 4))

    x_spec = pl.BlockSpec((tm, tk), lambda i, j, k: (i, k))
    w_spec = pl.BlockSpec((tk, tn), lambda i, j, k: (k, j))
    o_spec = pl.BlockSpec((tm, tn), lambda i, j, k: (i, j))
    scratch = [pltpu.VMEM((tm, tn), jnp.float32)]

    if bias is not None:
        out = pl.pallas_call(
            _linear_tiled_bias_kernel,
            out_shape=jax.ShapeDtypeStruct((m_pad, n_pad), out_dtype),
            grid_spec=pltpu.PrefetchScalarGridSpec(
                num_scalar_prefetch=0, grid=grid,
                in_specs=[x_spec, w_spec,
                          pl.BlockSpec((1, tn), lambda i, j, k: (0, j))],
                out_specs=o_spec, scratch_shapes=scratch),
            compiler_params=cparams, cost_estimate=cost,
        )(xp, wp, _pad_row(bias, n_pad))
    else:
        out = pl.pallas_call(
            _linear_tiled_nobias_kernel,
            out_shape=jax.ShapeDtypeStruct((m_pad, n_pad), out_dtype),
            grid_spec=pltpu.PrefetchScalarGridSpec(
                num_scalar_prefetch=0, grid=grid,
                in_specs=[x_spec, w_spec],
                out_specs=o_spec, scratch_shapes=scratch),
            compiler_params=cparams, cost_estimate=cost,
        )(xp, wp)
    return out[:M, :N]


def pallas_linear_bn(x, w_t, gamma, beta, *, eps=1e-5,
                     compute_dtype=_DEF_COMPUTE_DTYPE, out_dtype=None):
    """Fused y = BatchNorm1d(x @ w_t) with training-mode batch statistics."""
    M, K = x.shape
    Kw, N = w_t.shape
    assert K == Kw
    out_dtype = out_dtype or x.dtype
    cdt = compute_dtype or x.dtype
    itemsize = jnp.dtype(cdt).itemsize
    out_itemsize = jnp.dtype(out_dtype).itemsize

    if x.dtype != cdt:
        x = x.astype(cdt)
    if w_t.dtype != cdt:
        w_t = w_t.astype(cdt)

    ra = _row_align(cdt)
    m_pad = _round_up(M, ra)
    n0 = _round_up(N, _LANE)
    k0 = _round_up(K, _LANE)

    # Lane tiles that divide n0 exactly (no over-padding of the output).
    if n0 <= 256:
        tn = n0
    elif n0 % 256 == 0:
        tn = 256
    else:
        tn = 128

    # Pick the largest tk dividing k0 whose full-batch-resident working set
    # (x block double-buffered + w block + f32 acc + out block) fits VMEM.
    def _ws(tk_):
        return (2 * m_pad * tk_ * itemsize + 2 * tk_ * tn * itemsize
                + m_pad * tn * 4 + 2 * m_pad * tn * out_itemsize)
    cands = sorted({t for t in (k0, 512, 256, 128)
                    if t <= k0 and k0 % t == 0 and t % 128 == 0}, reverse=True)
    tk = next((t for t in cands if _ws(t) <= _VMEM_BUDGET), cands[-1])
    # TODO(synk): for batches where even tk=128 overflows VMEM, switch to a
    # two-pass sum / sum-of-squares scheme instead of keeping the batch resident.

    grid = (n0 // tn, k0 // tk)

    xp = _pad2(x, m_pad, k0)
    wp = _pad2(w_t, k0, n0)
    gp = _pad_row(gamma, n0)
    bp = _pad_row(beta, n0)

    kernel = functools.partial(_linear_bn_kernel, m_valid=M, eps=float(eps))
    cost = pl.CostEstimate(
        flops=2 * m_pad * n0 * k0,
        transcendentals=n0,
        bytes_accessed=int(m_pad * k0 * itemsize * grid[0]     # x re-read per N tile
                           + k0 * n0 * itemsize
                           + m_pad * n0 * out_itemsize))

    out = pl.pallas_call(
        kernel,
        out_shape=jax.ShapeDtypeStruct((m_pad, n0), out_dtype),
        grid_spec=pltpu.PrefetchScalarGridSpec(
            num_scalar_prefetch=0, grid=grid,
            in_specs=[
                pl.BlockSpec((m_pad, tk), lambda j, k: (0, k)),
                pl.BlockSpec((tk, tn), lambda j, k: (k, j)),
                pl.BlockSpec((1, tn), lambda j, k: (0, j)),
                pl.BlockSpec((1, tn), lambda j, k: (0, j)),
            ],
            out_specs=pl.BlockSpec((m_pad, tn), lambda j, k: (0, j)),
            scratch_shapes=[pltpu.VMEM((m_pad, tn), jnp.float32)]),
        compiler_params=pltpu.CompilerParams(
            dimension_semantics=("parallel", "arbitrary"),
            vmem_limit_bytes=_vmem_limit(_ws(tk))),
        cost_estimate=cost,
    )(xp, wp, gp, bp)
    return out[:M, :N]


def linear_layer_forward(x, params, use_bias=True, use_bn=False,
                         compute_dtype=_DEF_COMPUTE_DTYPE):
    """Mirrors LinearLayer.forward.

    Note: with use_bn=True the nn.Linear has no bias (bias=use_bias and not
    use_bn in the PyTorch module) — it is absorbed by the BatchNorm affine.
    TODO(synk): running-mean/var momentum update is a training side-effect,
    not part of the returned forward value; omitted here.
    """
    if use_bn:
        return pallas_linear_bn(x, params["w_t"], params["bn_gamma"],
                                params["bn_beta"], compute_dtype=compute_dtype)
    bias = params["bias"] if use_bias else None
    return pallas_linear(x, params["w_t"], bias, compute_dtype=compute_dtype)


def init_params(key, in_features, out_features, dtype=jnp.float32,
                compute_dtype=_DEF_COMPUTE_DTYPE):
    """nn.Linear-style U(-1/sqrt(in), 1/sqrt(in)) fan-in init.

    The weight is pre-cast to the MXU compute dtype ONCE here so the forward
    pass never pays a per-call HBM cast/copy; BN affine + bias stay f32.
    """
    k_w, k_b = jax.random.split(key)
    bound = float(in_features) ** -0.5
    w = jax.random.uniform(k_w, (out_features, in_features), dtype, -bound, bound)
    b = jax.random.uniform(k_b, (out_features,), dtype, -bound, bound)
    w_t = w.T                                            # (in_features, out_features)
    if compute_dtype is not None and w_t.dtype != compute_dtype:
        w_t = w_t.astype(compute_dtype)
    return {
        "w_t": w_t,
        "bias": b.astype(jnp.float32),
        "bn_gamma": jnp.ones((out_features,), jnp.float32),
        "bn_beta": jnp.zeros((out_features,), jnp.float32),
    }


# ----------------------------------------------------------------------------
# Demo / correctness check
# ----------------------------------------------------------------------------
if __name__ == "__main__":
    HIGH = jax.lax.Precision.HIGHEST

    def ref_linear(x, params, use_bias=True):
        xc = x.astype(_DEF_COMPUTE_DTYPE).astype(jnp.float32)
        wc = params["w_t"].astype(jnp.float32)
        y = jnp.dot(xc, wc, precision=HIGH)
        return y + params["bias"] if use_bias else y

    def ref_bn(x, params, eps=1e-5):
        z = ref_linear(x, params, use_bias=False)
        mu = z.mean(0, keepdims=True)
        var = ((z - mu) ** 2).mean(0, keepdims=True)
        return (z - mu) * jax.lax.rsqrt(var + eps) * params["bn_gamma"] \
            + params["bn_beta"]

    key = jax.random.PRNGKey(0)
    k_x, k_p, k_x2, k_p2, k_x3, k_p3 = jax.random.split(key, 6)

    # --- aligned shapes, weight-resident fast path ---------------------------
    batch, in_features, out_features = 8, 32, 128
    x = jax.random.normal(k_x, (batch, in_features), jnp.float32)
    params = init_params(k_p, in_features, out_features)

    y = jax.block_until_ready(linear_layer_forward(x, params))
    assert jnp.allclose(y, ref_linear(x, params), atol=1e-3), "linear mismatch"

    y_nb = jax.block_until_ready(linear_layer_forward(x, params, use_bias=False))
    assert jnp.allclose(y_nb, ref_linear(x, params, use_bias=False),
                        atol=1e-3), "no-bias linear mismatch"

    y_bn = jax.block_until_ready(
        linear_layer_forward(x, params, use_bias=True, use_bn=True))
    assert jnp.allclose(y_bn, ref_bn(x, params), atol=3e-3), "fused BN mismatch"

    # --- unaligned shapes (padding + masked BN statistics) -------------------
    batch2, in2, out2 = 10, 48, 96
    x2 = jax.random.normal(k_x2, (batch2, in2), jnp.float32)
    params2 = init_params(k_p2, in2, out2)

    y2 = jax.block_until_ready(linear_layer_forward(x2, params2))
    assert jnp.allclose(y2, ref_linear(x2, params2), atol=1e-3), \
        "unaligned linear mismatch"

    y2_bn = jax.block_until_ready(
        linear_layer_forward(x2, params2, use_bias=True, use_bn=True))
    assert jnp.allclose(y2_bn, ref_bn(x2, params2), atol=3e-3), \
        "unaligned fused BN mismatch"

    # --- tiled K-reduction path (forced, small tiles -> (1,2,2) grid) --------
    batch3, in3, out3 = 16, 256, 256
    x3 = jax.random.normal(k_x3, (batch3, in3), jnp.float32)
    params3 = init_params(k_p3, in3, out3)
    y3 = jax.block_until_ready(
        pallas_linear(x3, params3["w_t"], params3["bias"],
                      force_tiled=True, tile_caps=(16, 128, 128)))
    assert jnp.allclose(y3, ref_linear(x3, params3), atol=1e-3), \
        "tiled-path linear mismatch"

    # --- f32 compute path (no bf16 cast of x) ---------------------------------
    y_f32 = jax.block_until_ready(
        pallas_linear(x, params["w_t"], params["bias"],
                      compute_dtype=jnp.float32))
    y_f32_ref = jnp.dot(x, params["w_t"].astype(jnp.float32),
                        precision=HIGH) + params["bias"]
    assert jnp.allclose(y_f32, y_f32_ref, atol=2e-3), "f32-path linear mismatch"

    print("KERNEL_OK")
</pallas_src>

<mosaic_0001>
module attributes {stable_mosaic.version = 11 : i64} {
  func.func @_linear_resident_bias_kernel(%arg0: i32, %arg1: i32, %arg2: memref<16x128xbf16, #tpu.memory_space<vmem>>, %arg3: memref<128x128xbf16, #tpu.memory_space<vmem>>, %arg4: memref<1x128xf32, #tpu.memory_space<vmem>>, %arg5: memref<16x128xf32, #tpu.memory_space<vmem>>) attributes {dimension_semantics = [#tpu.dimension_semantics<parallel>, #tpu.dimension_semantics<parallel>], iteration_bounds = array<i64: 1, 1>, scalar_prefetch = 0 : i64, scratch_operands = 0 : i64, tpu.core_type = #tpu.core_type<tc>, window_params = [{transform_indices = @transform_0, window_bounds = array<i64: 16, 128>}, {transform_indices = @transform_1, window_bounds = array<i64: 128, 128>}, {transform_indices = @transform_2, window_bounds = array<i64: 1, 128>}, {transform_indices = @transform_3, window_bounds = array<i64: 16, 128>}]} {
    %c0 = arith.constant 0 : index
    %c0_0 = arith.constant 0 : index
    %0 = vector.load %arg2[%c0, %c0_0] : memref<16x128xbf16, #tpu.memory_space<vmem>>, vector<16x128xbf16>
    %c0_1 = arith.constant 0 : index
    %c0_2 = arith.constant 0 : index
    %1 = vector.load %arg3[%c0_1, %c0_2] : memref<128x128xbf16, #tpu.memory_space<vmem>>, vector<128x128xbf16>
    %cst = arith.constant dense<0.000000e+00> : vector<16x128xf32>
    %2 = tpu.matmul %0, %1, %cst {dimension_numbers = #tpu.dot_dimension_numbers<[1], [0], [0], [1], [0, 0, 1, 1], [], []>} : vector<16x128xbf16>, vector<128x128xbf16>, vector<16x128xf32> -> vector<16x128xf32>
    %c0_3 = arith.constant 0 : index
    %c0_4 = arith.constant 0 : index
    %3 = vector.load %arg4[%c0_3, %c0_4] : memref<1x128xf32, #tpu.memory_space<vmem>>, vector<1x128xf32>
    %4 = vector.broadcast %3 : vector<1x128xf32> to vector<16x128xf32>
    %5 = arith.addf %2, %4 : vector<16x128xf32>
    %c0_5 = arith.constant 0 : index
    %c0_6 = arith.constant 0 : index
    %6 = vector.load %arg5[%c0_5, %c0_6] : memref<16x128xf32, #tpu.memory_space<vmem>>, vector<16x128xf32>
    tpu.vector_store %arg5[%c0_5, %c0_6], %5 {strides = array<i32>} : memref<16x128xf32, #tpu.memory_space<vmem>>, vector<16x128xf32>,
    return
  }
  func.func @transform_0(%arg0: i32, %arg1: i32) -> (i32, i32) {
    %c0_i32 = arith.constant 0 : i32
    %c0_i32_0 = arith.constant 0 : i32
    return %arg0, %c0_i32 : i32, i32
  }
  func.func @transform_1(%arg0: i32, %arg1: i32) -> (i32, i32) {
    %c0_i32 = arith.constant 0 : i32
    %c0_i32_0 = arith.constant 0 : i32
    return %c0_i32, %arg1 : i32, i32
  }
  func.func @transform_2(%arg0: i32, %arg1: i32) -> (i32, i32) {
    %c0_i32 = arith.constant 0 : i32
    %c0_i32_0 = arith.constant 0 : i32
    return %c0_i32, %arg1 : i32, i32
  }
  func.func @transform_3(%arg0: i32, %arg1: i32) -> (i32, i32) {
    %c0_i32 = arith.constant 0 : i32
    return %arg0, %arg1 : i32, i32
  }
}

</mosaic_0001>

<bundles_post_ra>
// kernel: tpu_custom_call.1
= control target key start
LH: loop header
LB: loop body
LE: loop exit
PB: predicated region body
PF: predicated region fallthrough
CT: control target
= control target key end

     0   :  { %8 = vsyncpa [#allocation3], 0  ;;  %s381_s0 = inlined_call_operand.hbm [shape: bf16[16,128], index: 0, kind: input, shape index: {}]   ;;  %s382_s1 = inlined_call_operand.hbm [shape: bf16[128,128], index: 1, kind: input, shape index: {}]   ;;  %s383_s2 = inlined_call_operand.vmem [shape: f32[1,128], index: 2, kind: input, shape index: {}]   ;;  %s384_s3 = inlined_call_operand.hbm [shape: f32[16,128], index: 3, kind: output, shape index: {}]  }
   0x1   :  { %9 = vsyncpa [#allocation6], 0 }
   0x2   :  { %10 = vsyncpa [#allocation4], 0  ;;  %s313_s12 = smov [#allocation2]   ;;  %s241_s16 = scalar_lea.hbm %s381_s0, 128 }
   0x3   :  { %s16_s13 = sshll.u32 %s313_s12, 4  ;;  %p242_p0 = scmp.ne.s32.totalorder %s381_s0, %s241_s16  ;;  %s17_s13 = int_to_ptr.vmem [resolvable:$true] %s16_s13 }
   0x4   :  { %p245_p1 = scmp.lt.u32.totalorder %s241_s16, %s381_s0 }
   0x6   :  { %p247_p2 = pnand %p245_p1, %p242_p0 }
   0x8   :  { %250 = shalt.err (!%p247_p2)
}
   0x9   :  { %s251_s21 = scalar_lea.vmem %s17_s13, 128  ;;  %p256_p4 = scmp.lt.s32.totalorder %s17_s13, %s17_s13 }
   0xa   :  { %p252_p3 = scmp.ne.s32.totalorder %s17_s13, %s251_s21  ;;  %p257_p5 = scmp.lt.s32.totalorder %s251_s21, %s251_s21 }
   0xc   :  { %p258_p6 = por %p257_p5, %p256_p4 }
   0xe   :  { %p259_p7 = pnand %p258_p6, %p252_p3 }
  0x10   :  { %262 = shalt.err (!%p259_p7)
}
  0x11   :  { %s314_s22 = smov 64   ;;  %s315_s23 = smov 4  }
  0x12   :  { %22 = dma.hbm_to_vmem [thread:$0]  %s381_s0, 128, %s17_s13, [#allocation3], %s314_s22, %s314_s22, %s315_s23  }
  0x13   :  { %s316_s26 = smov [#allocation5]   ;;  %s263_s30 = scalar_lea.hbm %s382_s1, 1024 }
  0x14   :  { %s28_s27 = sshll.u32 %s316_s26, 4  ;;  %p264_p8 = scmp.ne.s32.totalorder %s382_s1, %s263_s30  ;;  %s29_s27 = int_to_ptr.vmem [resolvable:$true] %s28_s27 }
  0x15   :  { %p267_p9 = scmp.lt.u32.totalorder %s263_s30, %s382_s1 }
  0x17   :  { %p269_p10 = pnand %p267_p9, %p264_p8 }
  0x19   :  { %272 = shalt.err (!%p269_p10)
}
  0x1a   :  { %s273_s8 = scalar_lea.vmem %s29_s27, 1024  ;;  %p278_p12 = scmp.lt.s32.totalorder %s29_s27, %s29_s27 }
  0x1b   :  { %p274_p11 = scmp.ne.s32.totalorder %s29_s27, %s273_s8  ;;  %p279_p13 = scmp.lt.s32.totalorder %s273_s8, %s273_s8 }
  0x1d   :  { %p280_p0 = por %p279_p13, %p278_p12 }
  0x1f   :  { %p281_p1 = pnand %p280_p0, %p274_p11 }
  0x21   :  { %284 = shalt.err (!%p281_p1)
}
  0x22   :  { %34 = dma.hbm_to_vmem [thread:$0]  %s382_s1, 1024, %s29_s27, [#allocation6], %s314_s22, %s314_s22, %s315_s23  }
  0x23   :  { %307 = dma.done.wait [#allocation3], 128  }
  0x24   :  { %308 = vsyncadd [#allocation3], 4294967168 }
  0x25   :  { %309 = dma.done.wait [#allocation6], 1024  }
  0x26   :  { %310 = vsyncadd [#allocation6], 4294966272  ;;  %v317_v0 = vmov 0.0   ;;  %vm318_vm0 = vmmov 0   ;;  %v232_v1 = vld [vmem:[#allocation5] sm:$0xff]   ;;  %v233_v2 = vld [vmem:[#allocation5 + $0x8] sm:$0xff]  }
  0x27   :  { %203 = vmatprep.subr.bf16.mxu0 %v317_v0  ;;  %219 = vmatprep.mubr.msk.bf16.mxu0 %vm318_vm0, %v317_v0  ;;  %v234_v3 = vld [vmem:[#allocation5 + $0x10] sm:$0xff]   ;;  %v235_v4 = vld [vmem:[#allocation5 + $0x18] sm:$0xff]   ;;  %v236_v5 = vld [vmem:[#allocation5 + $0x20] sm:$0xff]   ;;  %s319_s11 = smov [#allocation7]  }
  0x28   :  { %204 = vmatpush3.bf16.msra.mxu0 %v232_v1  ;;  %v237_v6 = vld [vmem:[#allocation5 + $0x28] sm:$0xff]   ;;  %v238_v7 = vld [vmem:[#allocation5 + $0x30] sm:$0xff]   ;;  %v239_v8 = vld [vmem:[#allocation5 + $0x38] sm:$0xff]   ;;  %s171_s12 = sshll.u32 %s319_s11, 4  ;;  %s172_s12 = int_to_ptr.vmem [resolvable:$true] %s171_s12 }
  0x29   :  { %205 = vmatprep.subr.bf16.mxu0 %v317_v0  ;;  %v240_v9 = vld [vmem:[#allocation2] sm:$0xff]   ;;  %s285_s13 = scalar_lea.vmem %s172_s12, 256  ;;  %p290_p3 = scmp.lt.s32.totalorder %s172_s12, %s172_s12 }
  0x2a   :  { %v184_v10 = vld [vmem:[%s383_s2] ss:$0 sm:$0xff]  ;;  %p286_p2 = scmp.ne.s32.totalorder %s172_s12, %s285_s13  ;;  %p291_p4 = scmp.lt.s32.totalorder %s285_s13, %s285_s13 }
  0x2c   :  { %206 = vmatpush3.bf16.msra.mxu0 %v233_v2  ;;  %p292_p5 = por %p291_p4, %p290_p3 }
  0x2d   :  { %207 = vmatprep.subr.bf16.mxu0 %v317_v0 }
  0x2e   :  { %p293_p6 = pnand %p292_p5, %p286_p2 }
  0x30   :  { %208 = vmatpush3.bf16.msra.mxu0 %v234_v3 }
  0x31   :  { %209 = vmatprep.subr.bf16.mxu0 %v317_v0 }
  0x34   :  { %210 = vmatpush3.bf16.msra.mxu0 %v235_v4 }
  0x35   :  { %211 = vmatprep.subr.bf16.mxu0 %v317_v0 }
  0x38   :  { %212 = vmatpush3.bf16.msra.mxu0 %v236_v5 }
  0x39   :  { %213 = vmatprep.subr.bf16.mxu0 %v317_v0 }
  0x3c   :  { %214 = vmatpush3.bf16.msra.mxu0 %v237_v6 }
  0x3d   :  { %215 = vmatprep.subr.bf16.mxu0 %v317_v0 }
  0x40   :  { %216 = vmatpush3.bf16.msra.mxu0 %v238_v7 }
  0x41   :  { %217 = vmatprep.subr.bf16.mxu0 %v317_v0 }
  0x44   :  { %218 = vmatpush3.bf16.msra.mxu0 %v239_v8 }
  0x47   :  { %220 = vmatmul.mubr.bf16.vlgmr.msra.gmra.mrb[0].mxu0 %v240_v9 }
 0x11a   :  { %v157_v11 = vpop.f32.mrb[0].mxu0 }
 0x11b   :  { %v158_v12 = vadd.f32 %v184_v10, %v157_v11  ;;  %v221_v13 = vpop.f32.mrb[1].mxu0 }
 0x11c   :  { %v160_v14 = vpop.f32.mrb[2].mxu0 }
 0x11d   :  { %164 = vst [vmem:[#allocation7] sm:$0xff] %v158_v12  ;;  %v161_v15 = vadd.f32 %v184_v10, %v160_v14  ;;  %v222_v16 = vpop.f32.mrb[3].mxu0 }
 0x11f   :  { %165 = vst [vmem:[#allocation7 + $0x8] sm:$0xff] %v161_v15 }
 0x120   :  { %296 = shalt.err (!%p293_p6)
}
 0x121   :  { %s297_s15 = scalar_lea.hbm %s384_s3, 256 }
 0x122   :  { %p298_p7 = scmp.ne.s32.totalorder %s384_s3, %s297_s15  ;;  %p301_p8 = scmp.lt.u32.totalorder %s297_s15, %s384_s3 }
 0x124   :  { %p303_p9 = pnand %p301_p8, %p298_p7 }
 0x126   :  { %306 = shalt.err (!%p303_p9)
}
 0x127   :  { %s320_s20 = smov 128   ;;  %s321_s21 = smov 8  }
 0x128   :  { %177 = dma.vmem_to_hbm [thread:$0]  %s172_s12, 256, %s384_s3, [#allocation4], %s320_s20, %s320_s20, %s321_s21  }
 0x129   :  { %311 = dma.done.wait [#allocation4], 256  }
 0x12a   :  { %312 = vsyncadd [#allocation4], 4294967040 }
 0x12b   :  { %181 = vsyncpa [#allocation3], 1 }
 0x12c   :  { %182 = vsyncpa [#allocation6], 1 }
 0x12d   :  { %183 = vsyncpa [#allocation4], 1 }

</bundles_post_ra>
